<compile_context>
chip_gen: v7x
topology: tpu7x:2x2x1
jax: 0.10.0
libtpu: 0.0.40
codegen_flags: <defaults>
</compile_context>

<pallas_src>
import jax
import jax.numpy as jnp
from jax.experimental import pallas as pl
from jax.experimental.pallas import tpu as pltpu


def _round_up(x, m):
    return ((x + m - 1) // m) * m


def _make_gcn_kernel(hidden_resident, tk, acc_in_out):
    """Builds the adj @ hidden kernel body.

    Per-step refs (batch dim squeezed away):
      adj_ref : (TM, TK)                         -- dominant streamed HBM tile
      h_ref   : (Np, Fo) if hidden_resident else (TK, Fo)
      b_ref   : (1, Fo)
      out_ref : (TM, Fo)
      acc_ref : (TM, Fo) f32 scratch (omitted when accumulating into out_ref)
      den_ref : (TM, 1)  f32 scratch (adj row-sum accumulator)
    """

    def kernel(adj_ref, h_ref, b_ref, out_ref, *scratch):
        if acc_in_out:
            (den_ref,) = scratch
            acc_ref = out_ref          # output block index is constant over k
        else:
            acc_ref, den_ref = scratch

        k = pl.program_id(2)

        @pl.when(k == 0)
        def _init():
            acc_ref[...] = jnp.zeros_like(acc_ref)
            den_ref[...] = jnp.zeros_like(den_ref)

        adj = adj_ref[...]
        if hidden_resident:
            off = pl.multiple_of(k * tk, tk)
            h = h_ref[pl.ds(off, tk), :]
        else:
            h = h_ref[...]

        # adj @ hidden on the MXU, f32 accumulation.
        acc_ref[...] += jnp.dot(adj, h, preferred_element_type=jnp.float32)
        # Row-sum of this adj tile (denominator), accumulated in f32.
        den_ref[...] += jnp.sum(adj.astype(jnp.float32), axis=1, keepdims=True)

        @pl.when(k == pl.num_programs(2) - 1)
        def _finalize():
            denom = den_ref[...] + 1.0
            out = acc_ref[...].astype(jnp.float32) * pl.reciprocal(denom, approx=False)
            out = out + b_ref[...].astype(jnp.float32)
            out_ref[...] = out.astype(out_ref.dtype)

    return kernel


def graph_convolution(text, adj, weight, bias=None, *, compute_dtype=None):
    """text: [B, N, F_in], adj: [B, N, N], weight: [F_in, F_out], bias: [F_out] or None.

    compute_dtype: optional dtype (e.g. jnp.bfloat16) for the adj/hidden matmul
    operands.  Accumulation, denominator and the epilogue stay in f32; the
    output keeps text.dtype.  Default (None) is the exact f32 path.
    """
    B, N, F_in = text.shape
    F_out = weight.shape[1]
    out_dtype = text.dtype

    # hidden = text @ weight, precomputed once as a plain XLA matmul in f32.
    hidden = jnp.matmul(text.astype(jnp.float32), weight.astype(jnp.float32))

    if bias is None:
        bias = jnp.zeros((F_out,), jnp.float32)

    # ---- Per-generation VMEM capacity (v7x ~64 MiB, v5e/v6e 128 MiB) ----
    try:
        vmem_cap = pltpu.get_tpu_info().vmem_capacity_bytes
    except Exception:
        vmem_cap = 64 * 1024 * 1024
    small_vmem = vmem_cap <= 80 * 1024 * 1024      # v7x-class

    # ---- Tile sizes (size-robust: no O(N^2) VMEM blocks) ----
    LANE = 128
    if small_vmem:
        TM_BIG, TK_BIG = 512, 512                  # 1 MiB f32 adj tile (x2 buffered)
    else:
        TM_BIG, TK_BIG = 512, 1024                 # 2 MiB f32 adj tile (x2 buffered)

    Np = _round_up(N, LANE)                        # lane-dense adj tiles, clean MXU K
    if Np <= TK_BIG:
        TM = TK = Np
        # Keep the parallel grid extent >= 2 so both v7x TensorCores get work.
        if B == 1 and TM >= 16:
            TM = TM // 2
    else:
        TM, TK = TM_BIG, TK_BIG
        Np = _round_up(N, TK)                      # TK is a multiple of TM

    Fout_p = _round_up(F_out, LANE)                # lane-dense stores, full MXU columns

    mm_dtype = jnp.float32 if compute_dtype is None else jnp.dtype(compute_dtype)

    # ---- Zero-pad (exact: padded rows/cols contribute nothing; +1 keeps
    #      padded-row denominators nonzero) ----
    adj_p = jnp.pad(adj, ((0, 0), (0, Np - N), (0, Np - N))).astype(mm_dtype)
    hidden_p = jnp.pad(hidden, ((0, 0), (0, Np - N), (0, Fout_p - F_out))).astype(mm_dtype)
    bias_p = jnp.pad(bias.astype(jnp.float32), ((0, Fout_p - F_out),)).reshape(1, Fout_p)

    # ---- Hidden residency: keep the whole per-batch hidden slab in VMEM when
    #      its double-buffered footprint is <= 25% of VMEM, else stream tiles.
    h_bytes = 2 * Np * Fout_p * jnp.dtype(mm_dtype).itemsize
    hidden_resident = h_bytes <= vmem_cap // 4

    if hidden_resident:
        hidden_spec = pl.BlockSpec(
            (pl.Squeezed(), Np, Fout_p), lambda b, i, k: (b, 0, 0))
    else:
        hidden_spec = pl.BlockSpec(
            (pl.Squeezed(), TK, Fout_p), lambda b, i, k: (b, k, 0))

    # ---- f32 output: accumulate directly into the resident output block ----
    acc_in_out = jnp.dtype(out_dtype) == jnp.dtype(jnp.float32)
    scratch_shapes = []
    if not acc_in_out:
        scratch_shapes.append(pltpu.VMEM((TM, Fout_p), jnp.float32))
    scratch_shapes.append(pltpu.VMEM((TM, 1), jnp.float32))

    kernel = _make_gcn_kernel(hidden_resident, TK, acc_in_out)

    vmem_limit = min((vmem_cap * 3) // 4, 100 * 1024 * 1024)
    grid = (B, Np // TM, Np // TK)

    out_p = pl.pallas_call(
        kernel,
        out_shape=jax.ShapeDtypeStruct((B, Np, Fout_p), out_dtype),
        grid_spec=pltpu.PrefetchScalarGridSpec(
            num_scalar_prefetch=0,
            grid=grid,
            in_specs=[
                # adj: (row tile, contraction tile) -- the dominant HBM stream.
                pl.BlockSpec((pl.Squeezed(), TM, TK), lambda b, i, k: (b, i, k)),
                # hidden: resident per batch, or streamed (TK, Fout_p) tiles.
                hidden_spec,
                # bias: constant index map -> resident.
                pl.BlockSpec((1, Fout_p), lambda b, i, k: (0, 0)),
            ],
            out_specs=pl.BlockSpec(
                (pl.Squeezed(), TM, Fout_p), lambda b, i, k: (b, i, 0)),
            scratch_shapes=scratch_shapes,
        ),
        compiler_params=pltpu.CompilerParams(
            dimension_semantics=("parallel", "parallel", "arbitrary"),
            vmem_limit_bytes=vmem_limit,
        ),
    )(adj_p, hidden_p, bias_p)

    return out_p[:, :N, :F_out]


if __name__ == "__main__":
    B, N, F_in, F_out = 2, 8, 16, 32

    key = jax.random.PRNGKey(0)
    k_text, k_adj, k_w, k_b = jax.random.split(key, 4)

    text = jax.random.normal(k_text, (B, N, F_in), dtype=jnp.float32)
    # adjacency-like matrix (nonnegative)
    adj = jax.random.uniform(k_adj, (B, N, N), dtype=jnp.float32)
    # deterministic parameter init (shapes from module __init__)
    weight = jax.random.normal(k_w, (F_in, F_out), dtype=jnp.float32) * 0.1
    bias = jax.random.normal(k_b, (F_out,), dtype=jnp.float32) * 0.1

    # pure-JAX reference
    hidden_ref = jnp.matmul(text, weight)
    denom_ref = jnp.sum(adj, axis=2, keepdims=True) + 1.0
    ref = jnp.matmul(adj, hidden_ref) / denom_ref + bias

    # f32 path (bit-faithful to the PyTorch module)
    out = graph_convolution(text, adj, weight, bias)
    out = jax.block_until_ready(out)
    assert out.shape == (B, N, F_out)
    assert jnp.allclose(out, ref, atol=1e-5, rtol=1e-5)

    # bf16 operand path (halves the adj/hidden HBM streams; f32 accumulate/epilogue)
    out_bf16 = graph_convolution(text, adj, weight, bias, compute_dtype=jnp.bfloat16)
    out_bf16 = jax.block_until_ready(out_bf16)
    assert out_bf16.shape == (B, N, F_out)
    assert jnp.allclose(out_bf16, ref, atol=5e-2, rtol=5e-2)

    print("KERNEL_OK")
</pallas_src>

<mosaic_0001>
module attributes {stable_mosaic.version = 11 : i64} {
  func.func @kernel(%arg0: i32, %arg1: i32, %arg2: i32, %arg3: memref<1x128x128xf32, #tpu.memory_space<vmem>>, %arg4: memref<1x128x128xf32, #tpu.memory_space<vmem>>, %arg5: memref<1x128xf32, #tpu.memory_space<vmem>>, %arg6: memref<1x128x128xf32, #tpu.memory_space<vmem>>, %arg7: memref<128x1xf32, #tpu.memory_space<vmem>>) attributes {dimension_semantics = [#tpu.dimension_semantics<parallel>, #tpu.dimension_semantics<parallel>, #tpu.dimension_semantics<arbitrary>], iteration_bounds = array<i64: 2, 1, 1>, scalar_prefetch = 0 : i64, scratch_operands = 1 : i64, tpu.core_type = #tpu.core_type<tc>, window_params = [{transform_indices = @transform_0, window_bounds = array<i64: 1, 128, 128>}, {transform_indices = @transform_1, window_bounds = array<i64: 1, 128, 128>}, {pipeline_mode = #tpu.pipeline_mode<synchronous>, transform_indices = @transform_2, window_bounds = array<i64: 1, 128>}, {transform_indices = @transform_3, window_bounds = array<i64: 1, 128, 128>}]} {
    %c0_i32 = arith.constant 0 : i32
    %0 = arith.cmpi eq, %arg2, %c0_i32 : i32
    %1 = arith.extui %0 : i1 to i32
    %c0_i32_0 = arith.constant 0 : i32
    %2 = arith.cmpi ne, %1, %c0_i32_0 : i32
    scf.if %2 {
      %cst_18 = arith.constant 0.000000e+00 : f32
      %25 = vector.broadcast %cst_18 : f32 to vector<128x128xf32>
      %c0_19 = arith.constant 0 : index
      %c0_20 = arith.constant 0 : index
      %c0_21 = arith.constant 0 : index
      %26 = vector.load %arg6[%c0_19, %c0_20, %c0_21] : memref<1x128x128xf32, #tpu.memory_space<vmem>>, vector<1x128x128xf32>
      %27 = vector.shape_cast %26 : vector<1x128x128xf32> to vector<128x128xf32>
      %28 = vector.shape_cast %25 : vector<128x128xf32> to vector<1x128x128xf32>
      tpu.vector_store %arg6[%c0_19, %c0_20, %c0_21], %28 {strides = array<i32>} : memref<1x128x128xf32, #tpu.memory_space<vmem>>, vector<1x128x128xf32>,
      %cst_22 = arith.constant 0.000000e+00 : f32
      %29 = vector.broadcast %cst_22 : f32 to vector<128x1xf32>
      %c0_23 = arith.constant 0 : index
      %c0_24 = arith.constant 0 : index
      %30 = vector.load %arg7[%c0_23, %c0_24] : memref<128x1xf32, #tpu.memory_space<vmem>>, vector<128x1xf32>
      tpu.vector_store %arg7[%c0_23, %c0_24], %29 {strides = array<i32>} : memref<128x1xf32, #tpu.memory_space<vmem>>, vector<128x1xf32>,
    } else {
    }
    %c0 = arith.constant 0 : index
    %c0_1 = arith.constant 0 : index
    %c0_2 = arith.constant 0 : index
    %3 = vector.load %arg3[%c0, %c0_1, %c0_2] : memref<1x128x128xf32, #tpu.memory_space<vmem>>, vector<1x128x128xf32>
    %4 = vector.shape_cast %3 : vector<1x128x128xf32> to vector<128x128xf32>
    %c128_i32 = arith.constant 128 : i32
    %5 = arith.muli %arg2, %c128_i32 : i32
    %6 = tpu.assume_multiple %5, 128 : i32
    %c0_3 = arith.constant 0 : index
    %7 = arith.index_cast %6 : i32 to index
    %c0_4 = arith.constant 0 : index
    %8 = vector.load %arg4[%c0_3, %7, %c0_4] : memref<1x128x128xf32, #tpu.memory_space<vmem>>, vector<1x128x128xf32>
    %9 = vector.shape_cast %8 : vector<1x128x128xf32> to vector<128x128xf32>
    %c0_5 = arith.constant 0 : index
    %c0_6 = arith.constant 0 : index
    %c0_7 = arith.constant 0 : index
    %10 = vector.load %arg6[%c0_5, %c0_6, %c0_7] : memref<1x128x128xf32, #tpu.memory_space<vmem>>, vector<1x128x128xf32>
    %11 = vector.shape_cast %10 : vector<1x128x128xf32> to vector<128x128xf32>
    %cst = arith.constant dense<0.000000e+00> : vector<128x128xf32>
    %12 = tpu.matmul %4, %9, %cst {dimension_numbers = #tpu.dot_dimension_numbers<[1], [0], [0], [1], [0, 0, 1, 1], [], []>} : vector<128x128xf32>, vector<128x128xf32>, vector<128x128xf32> -> vector<128x128xf32>
    %13 = arith.addf %11, %12 : vector<128x128xf32>
    %c0_8 = arith.constant 0 : index
    %c0_9 = arith.constant 0 : index
    %c0_10 = arith.constant 0 : index
    %14 = vector.load %arg6[%c0_8, %c0_9, %c0_10] : memref<1x128x128xf32, #tpu.memory_space<vmem>>, vector<1x128x128xf32>
    %15 = vector.shape_cast %14 : vector<1x128x128xf32> to vector<128x128xf32>
    %16 = vector.shape_cast %13 : vector<128x128xf32> to vector<1x128x128xf32>
    tpu.vector_store %arg6[%c0_8, %c0_9, %c0_10], %16 {strides = array<i32>} : memref<1x128x128xf32, #tpu.memory_space<vmem>>, vector<1x128x128xf32>,
    %c0_11 = arith.constant 0 : index
    %c0_12 = arith.constant 0 : index
    %17 = vector.load %arg7[%c0_11, %c0_12] : memref<128x1xf32, #tpu.memory_space<vmem>>, vector<128x1xf32>
    %cst_13 = arith.constant dense<0.000000e+00> : vector<128xf32>
    %18 = vector.multi_reduction <add>, %4, %cst_13 [1] : vector<128x128xf32> to vector<128xf32>
    %19 = vector.shape_cast %18 : vector<128xf32> to vector<128x1xf32>
    %20 = arith.addf %17, %19 : vector<128x1xf32>
    %c0_14 = arith.constant 0 : index
    %c0_15 = arith.constant 0 : index
    %21 = vector.load %arg7[%c0_14, %c0_15] : memref<128x1xf32, #tpu.memory_space<vmem>>, vector<128x1xf32>
    tpu.vector_store %arg7[%c0_14, %c0_15], %20 {strides = array<i32>} : memref<128x1xf32, #tpu.memory_space<vmem>>, vector<128x1xf32>,
    %c0_i32_16 = arith.constant 0 : i32
    %22 = arith.cmpi eq, %arg2, %c0_i32_16 : i32
    %23 = arith.extui %22 : i1 to i32
    %c0_i32_17 = arith.constant 0 : i32
    %24 = arith.cmpi ne, %23, %c0_i32_17 : i32
    scf.if %24 {
      %c0_18 = arith.constant 0 : index
      %c0_19 = arith.constant 0 : index
      %25 = vector.load %arg7[%c0_18, %c0_19] : memref<128x1xf32, #tpu.memory_space<vmem>>, vector<128x1xf32>
      %cst_20 = arith.constant 1.000000e+00 : f32
      %26 = vector.broadcast %cst_20 : f32 to vector<128x1xf32>
      %27 = arith.addf %25, %26 : vector<128x1xf32>
      %c0_21 = arith.constant 0 : index
      %c0_22 = arith.constant 0 : index
      %c0_23 = arith.constant 0 : index
      %28 = vector.load %arg6[%c0_21, %c0_22, %c0_23] : memref<1x128x128xf32, #tpu.memory_space<vmem>>, vector<1x128x128xf32>
      %29 = vector.shape_cast %28 : vector<1x128x128xf32> to vector<128x128xf32>
      %30 = tpu.reciprocal %27 : vector<128x1xf32> -> vector<128x1xf32>
      %31 = vector.broadcast %30 : vector<128x1xf32> to vector<128x128xf32>
      %32 = arith.mulf %29, %31 : vector<128x128xf32>
      %c0_24 = arith.constant 0 : index
      %c0_25 = arith.constant 0 : index
      %33 = vector.load %arg5[%c0_24, %c0_25] : memref<1x128xf32, #tpu.memory_space<vmem>>, vector<1x128xf32>
      %34 = vector.broadcast %33 : vector<1x128xf32> to vector<128x128xf32>
      %35 = arith.addf %32, %34 : vector<128x128xf32>
      %c0_26 = arith.constant 0 : index
      %c0_27 = arith.constant 0 : index
      %c0_28 = arith.constant 0 : index
      %36 = vector.load %arg6[%c0_26, %c0_27, %c0_28] : memref<1x128x128xf32, #tpu.memory_space<vmem>>, vector<1x128x128xf32>
      %37 = vector.shape_cast %36 : vector<1x128x128xf32> to vector<128x128xf32>
      %38 = vector.shape_cast %35 : vector<128x128xf32> to vector<1x128x128xf32>
      tpu.vector_store %arg6[%c0_26, %c0_27, %c0_28], %38 {strides = array<i32>} : memref<1x128x128xf32, #tpu.memory_space<vmem>>, vector<1x128x128xf32>,
    } else {
    }
    return
  }
  func.func @transform_0(%arg0: i32, %arg1: i32, %arg2: i32) -> (i32, i32, i32) {
    %c0_i32 = arith.constant 0 : i32
    return %arg0, %arg1, %arg2 : i32, i32, i32
  }
  func.func @transform_1(%arg0: i32, %arg1: i32, %arg2: i32) -> (i32, i32, i32) {
    %c0_i32 = arith.constant 0 : i32
    %c0_i32_0 = arith.constant 0 : i32
    %c0_i32_1 = arith.constant 0 : i32
    return %arg0, %c0_i32, %c0_i32_0 : i32, i32, i32
  }
  func.func @transform_2(%arg0: i32, %arg1: i32, %arg2: i32) -> (i32, i32) {
    %c0_i32 = arith.constant 0 : i32
    %c0_i32_0 = arith.constant 0 : i32
    %c0_i32_1 = arith.constant 0 : i32
    return %c0_i32, %c0_i32_0 : i32, i32
  }
  func.func @transform_3(%arg0: i32, %arg1: i32, %arg2: i32) -> (i32, i32, i32) {
    %c0_i32 = arith.constant 0 : i32
    %c0_i32_0 = arith.constant 0 : i32
    return %arg0, %arg1, %c0_i32 : i32, i32, i32
  }
}

</mosaic_0001>

<bundles_post_ra>
// kernel: tpu_custom_call.1
= control target key start
LH: loop header
LB: loop body
LE: loop exit
PB: predicated region body
PF: predicated region fallthrough
CT: control target
= control target key end

     0   :  { %8 = vsyncpa [#allocation4], 0  ;;  %s1770_s0 = inlined_call_operand.hbm [shape: f32[2,128,128], index: 0, kind: input, shape index: {}]   ;;  %s1771_s1 = inlined_call_operand.hbm [shape: f32[2,128,128], index: 1, kind: input, shape index: {}]   ;;  %s1772_s2 = inlined_call_operand.vmem [shape: f32[1,128], index: 2, kind: input, shape index: {}]   ;;  %s1773_s3 = inlined_call_operand.hbm [shape: f32[2,128,128], index: 3, kind: output, shape index: {}]  }
   0x1   :  { %10 = vsyncpa [#allocation4 + $0x1], 0 }
   0x2   :  { %11 = vsyncpa [#allocation7], 0 }
   0x3   :  { %13 = vsyncpa [#allocation7 + $0x1], 0 }
   0x4   :  { %14 = vsyncpa [#allocation5], 0 }
   0x5   :  { %16 = vsyncpa [#allocation5 + $0x1], 0  ;;  %s1381_s12 = smov 0   ;;  %s1383_s13 = smov 0  }
   0x6   :  { %s1385_s14 = smov 0   ;;  %s1387_s15 = smov 0  }
   0x7   :  { %s1389_s16 = smov 0   ;;  %s1391_s17 = smov 0  }
   0x8 LB: > { %s938_s18 = sadd.s32 4294967295, %s1350_s17   ;;  %s939_s19 = sadd.s32 4294967294, %s1350_s17   ;;  %s1350_s17 = sphi %s1391_s17, %s22_s17   ;;  %s1346_s16 = sphi %s1389_s16, %s1791_s16   ;;  %s1342_s15 = sphi %s1387_s15, %s1790_s15   ;;  %s1338_s14 = sphi %s1385_s14, %s1789_s14   ;;  %s1334_s13 = sphi %s1383_s13, %s1788_s13   ;;  %s1330_s12 = sphi %s1381_s12, %s1787_s12  }
   0x9   : > { %s41_s20 = sadd.s32 1, %s1346_s16  ;;  %s52_s21 = sadd.s32 1, %s1338_s14 }
   0xa   : > { %p43_p0 = scmp.ge.s32.totalorder %s41_s20, 2  ;;  %p59_p1 = scmp.ne.s32.totalorder %s1338_s14, %s1334_s13 }
   0xb   : > { %p60_p2 = scmp.eq.s32.totalorder %s1350_s17, 0  ;;  %p65_p3 = scmp.ne.s32.totalorder %s1334_s13, %s1330_s12 }
   0xc   : > { %s1793_s20 = smov (%p43_p0, %s41_s20), 0  ;;  %p66_p5 = scmp.eq.s32.totalorder %s938_s18, 0 }
   0xd   : > { %p1422_p4 = por %p60_p2, %p59_p1  ;;  %s45_s23 = ssub.s32 %s1346_s16, %s1793_s20 }
   0xe   : > { %p138_p6 = scmp.eq.s32.totalorder %s938_s18, 1  ;;  %p50_p7 = scmp.eq.s32.totalorder %s45_s23, 0 }
   0xf   : > { %p1428_p8 = por %p66_p5, %p65_p3  ;;  %p144_p10 = scmp.eq.s32.totalorder %s939_s19, 1 }
  0x10   : > { %p1432_p9 = por %p138_p6, %p59_p1  ;;  %p1114_p13 = scmp.lt.s32.totalorder %s1350_s17, 2 }
  0x11   : > { %s1777_s24 = scalar_select %p1428_p8, 1, 0 }
  0x12   : > { %s1778_s25 = scalar_select %p1432_p9, 1, 0 }
  0x13   : > { %s1437_s26 = scalar_select %p50_p7, %s1338_s14, %s52_s21  }
  0x14   : > { %p1439_p11 = por %p144_p10, %p65_p3  ;;  %s1446_s28 = sand.u32 1, %s1338_s14  }
  0x15   : > { %s942_s29 = sshll.u32 %s1446_s28, 7  ;;  %s958_s30 = sshll.u32 %s1346_s16, 11 }
  0x16   : > { %s1779_s27 = scalar_select %p1439_p11, 1, 0 }
  0x17   : > { %s1455_s6 = scalar_lea.hbm %s1770_s0, %s958_s30  ;;  %s171_s7 = scalar_lea.vmem [#allocation3], %s942_s29 }
  0x18   : > { %s181_s8 = sshll.u32 %s171_s7, 4  ;;  %p1463_p0 = pnand %p1114_p13, %p1422_p4  ;;  %s1459_s8 = int_to_ptr.vmem [resolvable:$true] %s181_s8 }
  0x19   : > { %s168_s10 = scalar_lea.sflag [#allocation4], %s1446_s28  ;;  %s1204_s11 = scalar_lea.hbm %s1455_s6, 2048 }
  0x1a   : > { %p1205_p2 = scmp.ne.s32.totalorder %s1455_s6, %s1204_s11  ;;  %p1206_p3 = pneg %p1463_p0 }
  0x1b   : > { %s1209_s21 = scalar_lea.hbm %s1770_s0, 4096  ;;  %p1210_p4 = scmp.lt.u32.totalorder %s1455_s6, %s1770_s0 }
  0x1c   : > { %p1207_p5 = pnand %p1206_p3, %p1205_p2  ;;  %p1211_p7 = scmp.lt.u32.totalorder %s1209_s21, %s1204_s11 }
  0x1d   : > { %p1213_p13 = scmp.lt.u32.totalorder %s1204_s11, %s1455_s6 }
  0x1e   : > { %p1208_p6 = pneg %p1207_p5  ;;  %p1212_p10 = por %p1211_p7, %p1210_p4 }
  0x20   : > { %p1214_p12 = por %p1213_p13, %p1212_p10 }
  0x22   : > { %p1215_p1 = pnand %p1214_p12, %p1208_p6 }
  0x24   : > { %1218 = shalt.err (!%p1215_p1)
}
  0x25   : > { %s1219_s4 = scalar_lea.vmem %s1459_s8, 2048  ;;  %s1352_s5 = smov [#allocation3]  }
  0x26   : > { %p1220_p2 = scmp.ne.s32.totalorder %s1459_s8, %s1219_s4  ;;  %s1224_s7 = sshll.u32 %s1352_s5, 4  ;;  %s1225_s7 = int_to_ptr.vmem [resolvable:$false] %s1224_s7 }
  0x27   : > { %s1226_s18 = scalar_lea.vmem %s1225_s7, 4096  ;;  %p1227_p9 = scmp.lt.s32.totalorder %s1459_s8, %s1225_s7 }
  0x28   : > { %p1222_p5 = pnand %p1220_p2, %p1206_p3  ;;  %p1228_p4 = scmp.lt.s32.totalorder %s1226_s18, %s1219_s4 }
  0x2a   : > { %p1223_p11 = pneg %p1222_p5  ;;  %p1229_p7 = por %p1228_p4, %p1227_p9 }
  0x2c   : > { %p1230_p10 = pnand %p1229_p7, %p1223_p11 }
  0x2e   : > { %1233 = shalt.err (!%p1230_p10)
}
  0x2f   : > { %s1353_s11 = smov 128   ;;  %s1354_s19 = smov 8  }
  0x30   : > { %1106 = dma.hbm_to_vmem [thread:$0]  (!%p1463_p0), %s1455_s6, 2048, %s1459_s8, %s168_s10, %s1353_s11, %s1353_s11, %s1354_s19  }
  0x31   : > { %p210_p9 = scmp.lt.s32.totalorder %s1350_s17, 3  ;;  %s1505_s23 = scalar_lea.hbm %s1771_s1, %s958_s30 }
  0x32   : > { %p1781_p11 = scmp.ge.s32.totalorder %s1350_s17, 1  ;;  %s195_s5 = scalar_lea.vmem [#allocation6], %s942_s29 }
  0x33   : > { %s202_s7 = sshll.u32 %s195_s5, 4  ;;  %s192_s6 = scalar_lea.sflag [#allocation7], %s1446_s28  ;;  %s1515_s7 = int_to_ptr.vmem [resolvable:$true] %s202_s7 }
  0x34   : > { %p1509_p12 = pnand %p1781_p11, %p210_p9  ;;  %s1234_s8 = scalar_lea.hbm %s1505_s23, 2048 }
  0x35   : > { %p1235_p1 = scmp.ne.s32.totalorder %s1505_s23, %s1234_s8  ;;  %s1239_s18 = scalar_lea.hbm %s1771_s1, 4096 }
  0x36   : > { %p1240_p2 = scmp.lt.u32.totalorder %s1505_s23, %s1771_s1  ;;  %p1241_p5 = scmp.lt.u32.totalorder %s1239_s18, %s1234_s8 }
  0x37   : > { %p1237_p6 = pnand %p1235_p1, %p1206_p3  ;;  %p1243_p7 = scmp.lt.u32.totalorder %s1234_s8, %s1505_s23 }
  0x38   : > { %p1242_p4 = por %p1241_p5, %p1240_p2 }
  0x39   : > { %p1238_p13 = pneg %p1237_p6 }
  0x3a   : > { %p1244_p10 = por %p1243_p7, %p1242_p4 }
  0x3c   : > { %p1245_p9 = pnand %p1244_p10, %p1238_p13 }
  0x3e   : > { %1248 = shalt.err (!%p1245_p9)
}
  0x3f   : > { %s1249_s29 = scalar_lea.vmem %s1515_s7, 2048  ;;  %s1355_s5 = smov [#allocation6]  }
  0x40   : > { %p1250_p11 = scmp.ne.s32.totalorder %s1515_s7, %s1249_s29  ;;  %s1254_s30 = sshll.u32 %s1355_s5, 4  ;;  %s1255_s30 = int_to_ptr.vmem [resolvable:$false] %s1254_s30 }
  0x41   : > { %s1256_s10 = scalar_lea.vmem %s1255_s30, 4096  ;;  %p1257_p8 = scmp.lt.s32.totalorder %s1515_s7, %s1255_s30 }
  0x42   : > { %p1252_p1 = pnand %p1250_p11, %p1206_p3  ;;  %p1258_p2 = scmp.lt.s32.totalorder %s1256_s10, %s1249_s29 }
  0x44   : > { %p1253_p6 = pneg %p1252_p1  ;;  %p1259_p5 = por %p1258_p2, %p1257_p8 }
  0x46   : > { %p1260_p4 = pnand %p1259_p5, %p1253_p6 }
  0x48   : > { %1263 = shalt.err (!%p1260_p4)
}
  0x49   : > { %1109 = dma.hbm_to_vmem [thread:$0]  (!%p1463_p0), %s1505_s23, 2048, %s1515_s7, %s192_s6, %s1353_s11, %s1353_s11, %s1354_s19  }
  0x4a   : > { %214 = sbr.rel (%p1509_p12) target bundleno = 441 (0x1b9), region = 32  ;;  %s1549_s8 = sand.u32 (!%p1509_p12), 1, %s1334_s13  }
  0x4b   : > { %s1552_s18 = sshll.u32 (!%p1509_p12), %s1549_s8, 7  ;;  %s217_s9 = scalar_lea.sflag (!%p1509_p12), [#allocation4], %s1549_s8 }
  0x4c   : > { %s1556_s21 = scalar_lea.vmem (!%p1509_p12), [#allocation3], %s1552_s18  ;;  %p1783_p8 = scmp.ne.s32.totalorder (!%p1509_p12), %s1777_s24, 0 }
  0x51   : > { %1317 = dma.done.wait (%p1783_p8), %s217_s9, 2048  }
  0x52   : > { %1319 = vsyncadd (%p1783_p8), %s217_s9, 4294965248  ;;  %s226_s28 = scalar_lea.sflag [#allocation7], %s1549_s8  ;;  %s1564_s11 = scalar_lea.vmem [#allocation6], %s1552_s18 }
  0x53   : > { %1321 = dma.done.wait (%p1783_p8), %s226_s28, 2048  }
  0x54   : > { %1323 = vsyncadd (%p1783_p8), %s226_s28, 4294965248  ;;  %vm279_vm0 = vcmask 7168   ;;  %v1356_v0 = vmov 0.0   ;;  %v1587_v1 = vld [vmem:[%s1556_s21 + $0x10] sm:$0xff]  ;;  %v296_v2 = vld [vmem:[%s1556_s21] sm:$0xff]  ;;  %v1357_v41 = vmov 0  }
  0x55   : > { %282 = vst.msk [vmem:[#allocation2 + $0x10] sm:$0xff] %vm279_vm0, %v1356_v0  ;;  %280 = vst.msk [vmem:[#allocation2] sm:$0xff] %vm279_vm0, %v1356_v0  ;;  %543 = vadd.xlane.f32.xlu1 %v1587_v1  ;;  %539 = vadd.xlane.f32.xlu0 %v296_v2  ;;  %v1592_v3 = vld [vmem:[%s1556_s21 + $0x18] sm:$0xff]  ;;  %v1595_v4 = vld [vmem:[%s1556_s21 + $0x8] sm:$0xff]  ;;  %s1677_s23 = scalar_lea.vmem [#allocation8], %s1552_s18  ;;  %s960_s4 = sshll.u32 %s1342_s15, 11 }
  0x56   : > { %281 = vst.msk [vmem:[#allocation2 + $0x8] sm:$0xff] %vm279_vm0, %v1356_v0  ;;  %283 = vst.msk [vmem:[#allocation2 + $0x18] sm:$0xff] %vm279_vm0, %v1356_v0  ;;  %1025 = vmatprep.mubr.f32.mxu0 %v296_v2  ;;  %v314_v5 = vld [vmem:[%s1564_s11] sm:$0xff]  ;;  %v315_v7 = vld [vmem:[%s1564_s11 + $0x8] sm:$0xff]  ;;  %1170 = vset.pattern.permute.xlu0 %v1357_v41  ;;  %s822_s7 = sshll.u32 %s1677_s23, 4  ;;  %s1717_s29 = scalar_lea.hbm %s1773_s3, %s960_s4  ;;  %s1719_s7 = int_to_ptr.vmem [resolvable:$true] %s822_s7 }
  0x57   : > { %284 = vst.msk [vmem:[#allocation2 + $0x20] sm:$0xff] %vm279_vm0, %v1356_v0  ;;  %285 = vst.msk [vmem:[#allocation2 + $0x28] sm:$0xff] %vm279_vm0, %v1356_v0  ;;  %v304_v6 = vld [vmem:[%s1556_s21 + $0x40] sm:$0xff]  ;;  %v316_v8 = vld [vmem:[%s1564_s11 + $0x10] sm:$0xff]  ;;  %v1049_v11 = vpack.c.bf16 %v315_v7, %v314_v5  ;;  %1171 = vset.pattern.permute.xlu1 %v1357_v41  ;;  %s807_s5 = scalar_lea.sflag [#allocation5], %s1549_s8  ;;  %s1264_s15 = scalar_lea.vmem %s1719_s7, 2048 }
  0x58   : > { %286 = vst.msk [vmem:[#allocation2 + $0x30] sm:$0xff] %vm279_vm0, %v1356_v0  ;;  %287 = vst.msk [vmem:[#allocation2 + $0x38] sm:$0xff] %vm279_vm0, %v1356_v0  ;;  %v1604_v9 = vld [vmem:[%s1556_s21 + $0x28] sm:$0xff]  ;;  %v1607_v10 = vld [vmem:[%s1556_s21 + $0x20] sm:$0xff]  ;;  %1037 = vmatprep.mubr.f32.mxu1 %v304_v6  ;;  %p1265_p0 = scmp.ne.s32.totalorder %s1719_s7, %s1264_s15  ;;  %p1784_p3 = scmp.ne.s32.totalorder %s1778_s25, 0 }
  0x59   : > { %288 = vst.msk [vmem:[#allocation2 + $0x40] sm:$0xff] %vm279_vm0, %v1356_v0  ;;  %289 = vst.msk [vmem:[#allocation2 + $0x48] sm:$0xff] %vm279_vm0, %v1356_v0  ;;  %545 = vadd.xlane.f32.xlu1 %v1592_v3  ;;  %541 = vadd.xlane.f32.xlu0 %v1595_v4  ;;  %v317_v12 = vld [vmem:[%s1564_s11 + $0x18] sm:$0xff]  ;;  %v318_v14 = vld [vmem:[%s1564_s11 + $0x20] sm:$0xff]  ;;  %s1358_s30 = smov [#allocation8]  }
  0x5a   : > { %290 = vst.msk [vmem:[#allocation2 + $0x50] sm:$0xff] %vm279_vm0, %v1356_v0  ;;  %291 = vst.msk [vmem:[#allocation2 + $0x58] sm:$0xff] %vm279_vm0, %v1356_v0  ;;  %v1053_v13 = vpack.c.bf16 %v317_v12, %v316_v8  ;;  %1050 = vmatprep.subr.bf16.mxu0 %v1049_v11  ;;  %v319_v15 = vld [vmem:[%s1564_s11 + $0x28] sm:$0xff]  ;;  %1081 = vmatprep.subr.bf16.mxu1 %v1049_v11  ;;  %v1615_v16 = vld [vmem:[%s1556_s21 + $0x38] sm:$0xff]  ;;  %p1266_p12 = pnand %p1265_p0, %p1784_p3  ;;  %s1268_s10 = sshll.u32 %s1358_s30, 4  ;;  %s1269_s10 = int_to_ptr.vmem [resolvable:$false] %s1268_s10 }
  0x5b   : > { %292 = vst.msk [vmem:[#allocation2 + $0x60] sm:$0xff] %vm279_vm0, %v1356_v0  ;;  %293 = vst.msk [vmem:[#allocation2 + $0x68] sm:$0xff] %vm279_vm0, %v1356_v0  ;;  %v1618_v17 = vld [vmem:[%s1556_s21 + $0x30] sm:$0xff]  ;;  %1052 = vmatpush3.bf16.msra.mxu0 %v1049_v11  ;;  %1089 = vmatpush3.bf16.msra.mxu1 %v1049_v11  ;;  %v1057_v18 = vpack.c.bf16 %v319_v15, %v318_v14  ;;  %v321_v20 = vld [vmem:[%s1564_s11 + $0x38] sm:$0xff]  ;;  %s1270_s18 = scalar_lea.vmem %s1269_s10, 4096  ;;  %p1271_p7 = scmp.lt.s32.totalorder %s1719_s7, %s1269_s10 }
  0x5c   : > { %294 = vst.msk [vmem:[#allocation2 + $0x70] sm:$0xff] %vm279_vm0, %v1356_v0  ;;  %295 = vst.msk [vmem:[#allocation2 + $0x78] sm:$0xff] %vm279_vm0, %v1356_v0  ;;  %1054 = vmatprep.subr.bf16.mxu0 %v1053_v13  ;;  %1082 = vmatprep.subr.bf16.mxu1 %v1053_v13  ;;  %v320_v19 = vld [vmem:[%s1564_s11 + $0x30] sm:$0xff]  ;;  %v305_v21 = vld [vmem:[%s1556_s21 + $0x48] sm:$0xff]  ;;  %p1267_p13 = pneg %p1266_p12  ;;  %p1272_p10 = scmp.lt.s32.totalorder %s1270_s18, %s1264_s15 }
  0x5d   : > { %549 = vadd.xlane.f32.xlu1 %v1604_v9  ;;  %547 = vadd.xlane.f32.xlu0 %v1607_v10  ;;  %v1061_v22 = vpack.c.bf16 %v321_v20, %v320_v19  ;;  %v322_v23 = vld [vmem:[%s1564_s11 + $0x40] sm:$0xff]  ;;  %v323_v24 = vld [vmem:[%s1564_s11 + $0x48] sm:$0xff]  ;;  %v307_v25 = vld [vmem:[%s1556_s21 + $0x58] sm:$0xff] }
  0x5e   : > { %v306_v26 = vld [vmem:[%s1556_s21 + $0x50] sm:$0xff]  ;;  %v1065_v27 = vpack.c.bf16 %v323_v24, %v322_v23  ;;  %v325_v29 = vld [vmem:[%s1564_s11 + $0x58] sm:$0xff]  ;;  %v309_v30 = vld [vmem:[%s1556_s21 + $0x68] sm:$0xff]  ;;  %p1273_p9 = por %p1272_p10, %p1271_p7 }
  0x5f   : > { %1056 = vmatpush3.bf16.msra.mxu0 %v1053_v13  ;;  %1090 = vmatpush3.bf16.msra.mxu1 %v1053_v13  ;;  %v324_v28 = vld [vmem:[%s1564_s11 + $0x50] sm:$0xff]  ;;  %v308_v31 = vld [vmem:[%s1556_s21 + $0x60] sm:$0xff]  ;;  %v327_v34 = vld [vmem:[%s1564_s11 + $0x68] sm:$0xff] }
  0x60   : > { %1058 = vmatprep.subr.bf16.mxu0 %v1057_v18  ;;  %1083 = vmatprep.subr.bf16.mxu1 %v1057_v18  ;;  %v1069_v32 = vpack.c.bf16 %v325_v29, %v324_v28  ;;  %v326_v33 = vld [vmem:[%s1564_s11 + $0x60] sm:$0xff]  ;;  %v311_v35 = vld [vmem:[%s1556_s21 + $0x78] sm:$0xff]  ;;  %v310_v36 = vld [vmem:[%s1556_s21 + $0x70] sm:$0xff]  ;;  %p1274_p11 = pnand %p1273_p9, %p1267_p13 }
  0x61   : > { %553 = vadd.xlane.f32.xlu1 %v1615_v16  ;;  %551 = vadd.xlane.f32.xlu0 %v1618_v17  ;;  %v1073_v37 = vpack.c.bf16 %v327_v34, %v326_v33  ;;  %v328_v38 = vld [vmem:[%s1564_s11 + $0x70] sm:$0xff]  ;;  %v329_v39 = vld [vmem:[%s1564_s11 + $0x78] sm:$0xff]  ;;  %v523_v43 = vld [vmem:[#allocation2] sm:$0xff] }
  0x62   : > { %v1077_v40 = vpack.c.bf16 %v329_v39, %v328_v38  ;;  %v525_v42 = vld [vmem:[#allocation2 + $0x10] sm:$0xff]  ;;  %v526_v48 = vld [vmem:[#allocation2 + $0x18] sm:$0xff]  ;;  %v524_v49 = vld [vmem:[#allocation2 + $0x8] sm:$0xff] }
  0x63   : > { %1060 = vmatpush3.bf16.msra.mxu0 %v1057_v18  ;;  %1091 = vmatpush3.bf16.msra.mxu1 %v1057_v18  ;;  %v528_v54 = vld [vmem:[#allocation2 + $0x28] sm:$0xff]  ;;  %v527_v55 = vld [vmem:[#allocation2 + $0x20] sm:$0xff]  ;;  %v530_v60 = vld [vmem:[#allocation2 + $0x38] sm:$0xff] }
  0x64   : > { %1062 = vmatprep.subr.bf16.mxu0 %v1061_v22  ;;  %1084 = vmatprep.subr.bf16.mxu1 %v1061_v22  ;;  %v529_v61 = vld [vmem:[#allocation2 + $0x30] sm:$0xff]  ;;  %v532_v5 = vld [vmem:[#allocation2 + $0x48] sm:$0xff]  ;;  %v531_v7 = vld [vmem:[#allocation2 + $0x40] sm:$0xff] }
  0x65   : > { %557 = vadd.xlane.f32.xlu1 %v305_v21  ;;  %555 = vadd.xlane.f32.xlu0 %v304_v6  ;;  %v534_v15 = vld [vmem:[#allocation2 + $0x58] sm:$0xff]  ;;  %v536_v23 = vld [vmem:[#allocation2 + $0x68] sm:$0xff]  ;;  %v535_v24 = vld [vmem:[#allocation2 + $0x60] sm:$0xff] }
  0x66   : > { %v537_v34 = vld [vmem:[#allocation2 + $0x70] sm:$0xff] }
  0x67   : > { %1064 = vmatpush3.bf16.msra.mxu0 %v1061_v22  ;;  %1092 = vmatpush3.bf16.msra.mxu1 %v1061_v22 }
  0x68   : > { %1066 = vmatprep.subr.bf16.mxu0 %v1065_v27  ;;  %1085 = vmatprep.subr.bf16.mxu1 %v1065_v27 }
  0x69   : > { %561 = vadd.xlane.f32.xlu1 %v307_v25  ;;  %559 = vadd.xlane.f32.xlu0 %v306_v26 }
  0x6b   : > { %1068 = vmatpush3.bf16.msra.mxu0 %v1065_v27  ;;  %1093 = vmatpush3.bf16.msra.mxu1 %v1065_v27 }
  0x6c   : > { %1070 = vmatprep.subr.bf16.mxu0 %v1069_v32  ;;  %1086 = vmatprep.subr.bf16.mxu1 %v1069_v32 }
  0x6d   : > { %565 = vadd.xlane.f32.xlu1 %v309_v30  ;;  %563 = vadd.xlane.f32.xlu0 %v308_v31 }
  0x6f   : > { %1072 = vmatpush3.bf16.msra.mxu0 %v1069_v32  ;;  %1094 = vmatpush3.bf16.msra.mxu1 %v1069_v32  ;;  %v538_v32 = vld [vmem:[#allocation2 + $0x78] sm:$0xff] }
  0x70   : > { %1074 = vmatprep.subr.bf16.mxu0 %v1073_v37  ;;  %1087 = vmatprep.subr.bf16.mxu1 %v1073_v37 }
  0x71   : > { %569 = vadd.xlane.f32.xlu1 %v311_v35  ;;  %567 = vadd.xlane.f32.xlu0 %v310_v36 }
  0x73   : > { %1076 = vmatpush3.bf16.msra.mxu0 %v1073_v37  ;;  %1095 = vmatpush3.bf16.msra.mxu1 %v1073_v37 }
  0x74   : > { %1078 = vmatprep.subr.bf16.mxu0 %v1077_v40  ;;  %1088 = vmatprep.subr.bf16.mxu1 %v1077_v40 }
  0x77   : > { %1080 = vmatpush3.bf16.msra.mxu0 %v1077_v40  ;;  %1096 = vmatpush3.bf16.msra.mxu1 %v1077_v40 }
  0x7a   : > { %1026 = vmatmul.mubr.f32.vlgmr.msra.gmra.mrb[0].mxu0 %v1595_v4  ;;  %1038 = vmatmul.mubr.f32.vlgmr.msra.gmra.mrb[0].mxu1 %v305_v21 }
  0x7b   : > { %1028 = vmatprep.mubr.f32.mxu0 %v1587_v1  ;;  %1040 = vmatprep.mubr.f32.mxu1 %v306_v26 }
  0x7e   : > { %1029 = vmatmul.mubr.f32.gmra.mrb[2].mxu0 %v1592_v3  ;;  %1041 = vmatmul.mubr.f32.gmra.mrb[2].mxu1 %v307_v25 }
  0x7f   : > { %1031 = vmatprep.mubr.f32.mxu0 %v1607_v10  ;;  %1043 = vmatprep.mubr.f32.mxu1 %v308_v31 }
  0x82   : > { %1032 = vmatmul.mubr.f32.gmra.mrb[4].mxu0 %v1604_v9  ;;  %1044 = vmatmul.mubr.f32.gmra.mrb[4].mxu1 %v309_v30 }
  0x83   : > { %1034 = vmatprep.mubr.f32.mxu0 %v1618_v17  ;;  %1046 = vmatprep.mubr.f32.mxu1 %v310_v36 }
  0x86   : > { %1035 = vmatmul.mubr.f32.gmra.mrb[6].mxu0 %v1615_v16  ;;  %1047 = vmatmul.mubr.f32.gmra.mrb[6].mxu1 %v311_v35  ;;  %v533_v16 = vld [vmem:[#allocation2 + $0x50] sm:$0xff] }
  0xe2   : > { %v544_v44 = vpop.xlane.xlu1 %543  ;;  %v540_v45 = vpop.xlane.xlu0 %539 }
  0xe3   : > { %v573_v46 = vadd.f32 %v544_v44, %v525_v42  ;;  %v571_v47 = vadd.f32 %v540_v45, %v523_v43 }
  0xe5   : > { %590 = vst.msk [vmem:[#allocation2 + $0x10] sm:$0xff] %vm279_vm0, %v573_v46  ;;  %588 = vst.msk [vmem:[#allocation2] sm:$0xff] %vm279_vm0, %v571_v47 }
  0xe6   : > { %v546_v50 = vpop.xlane.xlu1 %545  ;;  %v542_v51 = vpop.xlane.xlu0 %541 }
  0xe7   : > { %v574_v52 = vadd.f32 %v546_v50, %v526_v48  ;;  %v572_v53 = vadd.f32 %v542_v51, %v524_v49 }
  0xe9   : > { %591 = vst.msk [vmem:[#allocation2 + $0x18] sm:$0xff] %vm279_vm0, %v574_v52  ;;  %589 = vst.msk [vmem:[#allocation2 + $0x8] sm:$0xff] %vm279_vm0, %v572_v53 }
  0xea   : > { %v550_v56 = vpop.xlane.xlu1 %549  ;;  %v548_v57 = vpop.xlane.xlu0 %547 }
  0xeb   : > { %v576_v58 = vadd.f32 %v550_v56, %v528_v54  ;;  %v575_v59 = vadd.f32 %v548_v57, %v527_v55 }
  0xec   : > { %v607_v62 = vld [vmem:[#allocation2] sm:$0xff]  ;;  %v609_v2 = vld [vmem:[#allocation2 + $0x10] sm:$0xff] }
  0xed   : > { %593 = vst.msk [vmem:[#allocation2 + $0x28] sm:$0xff] %vm279_vm0, %v576_v58  ;;  %592 = vst.msk [vmem:[#allocation2 + $0x20] sm:$0xff] %vm279_vm0, %v575_v59  ;;  %v623_v63 = vadd.f32 1.0, %v607_v62  ;;  %v625_v9 = vadd.f32 1.0, %v609_v2 }
  0xee   : > { %v554_v0 = vpop.xlane.xlu1 %553  ;;  %v552_v1 = vpop.xlane.xlu0 %551 }
  0xef   : > { %v578_v3 = vadd.f32 %v554_v0, %v530_v60  ;;  %v577_v4 = vadd.f32 %v552_v1, %v529_v61  ;;  %1172 = vrcp.f32 %v623_v63 }
  0xf0   : > { %v608_v6 = vld [vmem:[#allocation2 + $0x8] sm:$0xff]  ;;  %v610_v12 = vld [vmem:[#allocation2 + $0x18] sm:$0xff] }
  0xf1   : > { %595 = vst.msk [vmem:[#allocation2 + $0x38] sm:$0xff] %vm279_vm0, %v578_v3  ;;  %594 = vst.msk [vmem:[#allocation2 + $0x30] sm:$0xff] %vm279_vm0, %v577_v4  ;;  %v624_v8 = vadd.f32 1.0, %v608_v6  ;;  %v626_v17 = vadd.f32 1.0, %v610_v12 }
  0xf2   : > { %v558_v10 = vpop.xlane.xlu1 %557  ;;  %v556_v11 = vpop.xlane.xlu0 %555 }
  0xf3   : > { %v580_v13 = vadd.f32 %v558_v10, %v532_v5  ;;  %1174 = vrcp.f32 %v624_v8  ;;  %v579_v14 = vadd.f32 %v556_v11, %v531_v7 }
  0xf4   : > { %1176 = vrcp.f32 %v625_v9  ;;  %v611_v20 = vld [vmem:[#allocation2 + $0x20] sm:$0xff]  ;;  %v612_v29 = vld [vmem:[#allocation2 + $0x28] sm:$0xff] }
  0xf5   : > { %597 = vst.msk [vmem:[#allocation2 + $0x48] sm:$0xff] %vm279_vm0, %v580_v13  ;;  %596 = vst.msk [vmem:[#allocation2 + $0x40] sm:$0xff] %vm279_vm0, %v579_v14  ;;  %1178 = vrcp.f32 %v626_v17  ;;  %v627_v26 = vadd.f32 1.0, %v611_v20  ;;  %v628_v37 = vadd.f32 1.0, %v612_v29 }
  0xf6   : > { %v562_v18 = vpop.xlane.xlu1 %561  ;;  %v560_v19 = vpop.xlane.xlu0 %559 }
  0xf7   : > { %v582_v21 = vadd.f32 %v562_v18, %v534_v15  ;;  %v581_v22 = vadd.f32 %v560_v19, %v533_v16  ;;  %1180 = vrcp.f32 %v627_v26  ;;  %v1673_v26 = vld [vmem:[%s1772_s2] ss:$0 sm:$0xff] }
  0xf8   : > { %v613_v40 = vld [vmem:[#allocation2 + $0x30] sm:$0xff]  ;;  %v614_v47 = vld [vmem:[#allocation2 + $0x38] sm:$0xff] }
  0xf9   : > { %v1173_v25 = vpop.eup %1172  ;;  %599 = vst.msk [vmem:[#allocation2 + $0x58] sm:$0xff] %vm279_vm0, %v582_v21  ;;  %598 = vst.msk [vmem:[#allocation2 + $0x50] sm:$0xff] %vm279_vm0, %v581_v22  ;;  %v629_v46 = vadd.f32 1.0, %v613_v40  ;;  %v630_v51 = vadd.f32 1.0, %v614_v47 }
  0xfa   : > { %v566_v27 = vpop.xlane.xlu1 %565  ;;  %673 = vperm.xlu0 %1170, %v1173_v25   ;;  %v564_v28 = vpop.xlane.xlu0 %563 }
  0xfb   : > { %v584_v30 = vadd.f32 %v566_v27, %v536_v23  ;;  %v583_v31 = vadd.f32 %v564_v28, %v535_v24 }
  0xfc   : > { %v616_v33 = vld [vmem:[#allocation2 + $0x48] sm:$0xff]  ;;  %v615_v52 = vld [vmem:[#allocation2 + $0x40] sm:$0xff] }
  0xfd   : > { %v1175_v35 = vpop.eup %1174  ;;  %601 = vst.msk [vmem:[#allocation2 + $0x68] sm:$0xff] %vm279_vm0, %v584_v30  ;;  %600 = vst.msk [vmem:[#allocation2 + $0x60] sm:$0xff] %vm279_vm0, %v583_v31  ;;  %v632_v36 = vadd.f32 1.0, %v616_v33  ;;  %v631_v57 = vadd.f32 1.0, %v615_v52 }
  0xfe   : > { %v570_v38 = vpop.xlane.xlu1 %569  ;;  %678 = vperm.xlu1 %1171, %v1175_v35   ;;  %v568_v39 = vpop.xlane.xlu0 %567 }
  0xff   : > { %v1177_v41 = vpop.eup %1176  ;;  %v586_v42 = vadd.f32 %v570_v38, %v538_v32  ;;  %1182 = vrcp.f32 %v632_v36  ;;  %v585_v43 = vadd.f32 %v568_v39, %v537_v34 }
 0x100   : > { %v618_v44 = vld [vmem:[#allocation2 + $0x58] sm:$0xff]  ;;  %1184 = vrcp.f32 %v628_v37  ;;  %v1179_v48 = vpop.eup %1178  ;;  %v617_v58 = vld [vmem:[#allocation2 + $0x50] sm:$0xff] }
 0x101   : > { %603 = vst.msk [vmem:[#allocation2 + $0x78] sm:$0xff] %vm279_vm0, %v586_v42  ;;  %602 = vst.msk [vmem:[#allocation2 + $0x70] sm:$0xff] %vm279_vm0, %v585_v43  ;;  %v634_v45 = vadd.f32 1.0, %v618_v44  ;;  %v1181_v53 = vpop.eup %1180  ;;  %v633_v61 = vadd.f32 1.0, %v617_v58 }
 0x102   : > { %683 = vperm.xlu1 %1171, %v1177_v41  }
 0x103   : > { %1186 = vrcp.f32 %v634_v45 }
 0x104   : > { %v620_v49 = vld [vmem:[#allocation2 + $0x68] sm:$0xff]  ;;  %1188 = vrcp.f32 %v629_v46  ;;  %v619_v62 = vld [vmem:[#allocation2 + $0x60] sm:$0xff] }
 0x105   : > { %v636_v50 = vadd.f32 1.0, %v620_v49  ;;  %v635_v1 = vadd.f32 1.0, %v619_v62 }
 0x106   : > { %688 = vperm.xlu1 %1171, %v1179_v48  }
 0x107   : > { %1190 = vrcp.f32 %v636_v50 }
 0x108   : > { %v622_v54 = vld [vmem:[#allocation2 + $0x78] sm:$0xff]  ;;  %1192 = vrcp.f32 %v630_v51  ;;  %v621_v2 = vld [vmem:[#allocation2 + $0x70] sm:$0xff] }
 0x109   : > { %v1183_v55 = vpop.eup %1182  ;;  %v638_v56 = vadd.f32 1.0, %v622_v54  ;;  %v637_v5 = vadd.f32 1.0, %v621_v2 }
 0x10a   : > { %693 = vperm.xlu1 %1171, %v1181_v53   ;;  %718 = vperm.xlu0 %1170, %v1183_v55   ;;  %v1185_v59 = vpop.eup %1184 }
 0x10b   : > { %1194 = vrcp.f32 %v638_v56 }
 0x10c   : > { %1196 = vrcp.f32 %v631_v57 }
 0x10d   : > { %v1187_v60 = vpop.eup %1186  ;;  %1198 = vrcp.f32 %v633_v61 }
 0x10e   : > { %698 = vperm.xlu1 %1171, %v1185_v59   ;;  %728 = vperm.xlu0 %1170, %v1187_v60   ;;  %v1189_v63 = vpop.eup %1188  ;;  %1200 = vrcp.f32 %v635_v1 }
 0x10f   : > { %1202 = vrcp.f32 %v637_v5 }
 0x111   : > { %v1191_v0 = vpop.eup %1190 }
 0x112   : > { %703 = vperm.xlu1 %1171, %v1189_v63   ;;  %738 = vperm.xlu0 %1170, %v1191_v0   ;;  %v1193_v3 = vpop.eup %1192 }
 0x115   : > { %v1195_v4 = vpop.eup %1194 }
 0x116   : > { %708 = vperm.xlu1 %1171, %v1193_v3   ;;  %748 = vperm.xlu0 %1170, %v1195_v4   ;;  %v1197_v6 = vpop.eup %1196 }
 0x117   : > { %v1199_v7 = vpop.eup %1198 }
 0x118   : > { %v1201_v8 = vpop.eup %1200 }
 0x119   : > { %v1203_v9 = vpop.eup %1202 }
 0x11a   : > { %713 = vperm.xlu1 %1171, %v1197_v6  }
 0x11e   : > { %723 = vperm.xlu1 %1171, %v1199_v7  }
 0x122   : > { %733 = vperm.xlu1 %1171, %v1201_v8  }
 0x126   : > { %743 = vperm.xlu1 %1171, %v1203_v9  }
 0x14d   : > { %v1027_v10 = vpop.f32.mrb[0].mxu0  ;;  %v1039_v11 = vpop.f32.mrb[0].mxu1 }
 0x14e   : > { %v412_v12 = vpop.f32.mrb[1].mxu0  ;;  %v1662_v13 = vpop.f32.mrb[1].mxu1 }
 0x151   : > { %v1030_v14 = vpop.f32.mrb[2].mxu0  ;;  %v1042_v15 = vpop.f32.mrb[2].mxu1 }
 0x152   : > { %v422_v16 = vpop.f32.mrb[3].mxu0  ;;  %v1664_v17 = vpop.f32.mrb[3].mxu1 }
 0x155   : > { %v1033_v18 = vpop.f32.mrb[4].mxu0  ;;  %v1045_v19 = vpop.f32.mrb[4].mxu1 }
 0x156   : > { %v432_v20 = vpop.f32.mrb[5].mxu0  ;;  %v1666_v21 = vpop.f32.mrb[5].mxu1 }
 0x159   : > { %v1036_v22 = vpop.f32.mrb[6].mxu0  ;;  %v1048_v23 = vpop.f32.mrb[6].mxu1 }
 0x15a   : > { %v442_v24 = vpop.f32.mrb[7].mxu0  ;;  %v1668_v25 = vpop.f32.mrb[7].mxu1 }
 0x179   : > { %v674_v27 = vpop.permute.xlu0 %673 }
 0x17a   : > { %v751_v28 = vmul.f32 %v674_v27, %v412_v12 }
 0x17c   : > { %v774_v29 = vadd.f32 %v1673_v26, %v751_v28 }
 0x17d   : > { %v679_v30 = vpop.permute.xlu1 %678 }
 0x17e   : > { %790 = vst [vmem:[%s1677_s23] sm:$0xff] %v774_v29  ;;  %v752_v31 = vmul.f32 %v1027_v10, %v679_v30 }
 0x180   : > { %v775_v32 = vadd.f32 %v1673_v26, %v752_v31 }
 0x181   : > { %v684_v33 = vpop.permute.xlu1 %683 }
 0x182   : > { %791 = vst [vmem:[%s1677_s23 + $0x8] sm:$0xff] %v775_v32  ;;  %v753_v34 = vmul.f32 %v684_v33, %v422_v16 }
 0x184   : > { %v776_v35 = vadd.f32 %v1673_v26, %v753_v34 }
 0x185   : > { %v689_v36 = vpop.permute.xlu1 %688 }
 0x186   : > { %792 = vst [vmem:[%s1677_s23 + $0x10] sm:$0xff] %v776_v35  ;;  %v754_v37 = vmul.f32 %v1030_v14, %v689_v36 }
 0x188   : > { %v777_v38 = vadd.f32 %v1673_v26, %v754_v37 }
 0x189   : > { %v694_v39 = vpop.permute.xlu1 %693  ;;  %v719_v40 = vpop.permute.xlu0 %718 }
 0x18a   : > { %793 = vst [vmem:[%s1677_s23 + $0x18] sm:$0xff] %v777_v38  ;;  %v755_v41 = vmul.f32 %v694_v39, %v432_v20  ;;  %v760_v42 = vmul.f32 %v1039_v11, %v719_v40 }
 0x18c   : > { %v778_v43 = vadd.f32 %v1673_v26, %v755_v41  ;;  %v783_v44 = vadd.f32 %v1673_v26, %v760_v42 }
 0x18d   : > { %v699_v45 = vpop.permute.xlu1 %698  ;;  %v729_v46 = vpop.permute.xlu0 %728 }
 0x18e   : > { %794 = vst [vmem:[%s1677_s23 + $0x20] sm:$0xff] %v778_v43  ;;  %799 = vst [vmem:[%s1677_s23 + $0x48] sm:$0xff] %v783_v44  ;;  %v756_v47 = vmul.f32 %v1033_v18, %v699_v45  ;;  %v762_v48 = vmul.f32 %v1042_v15, %v729_v46 }
 0x190   : > { %v779_v49 = vadd.f32 %v1673_v26, %v756_v47  ;;  %v785_v50 = vadd.f32 %v1673_v26, %v762_v48 }
 0x191   : > { %v704_v51 = vpop.permute.xlu1 %703  ;;  %v739_v52 = vpop.permute.xlu0 %738 }
 0x192   : > { %795 = vst [vmem:[%s1677_s23 + $0x28] sm:$0xff] %v779_v49  ;;  %801 = vst [vmem:[%s1677_s23 + $0x58] sm:$0xff] %v785_v50  ;;  %v757_v53 = vmul.f32 %v704_v51, %v442_v24  ;;  %v764_v54 = vmul.f32 %v1045_v19, %v739_v52 }
 0x194   : > { %v780_v55 = vadd.f32 %v1673_v26, %v757_v53  ;;  %v787_v56 = vadd.f32 %v1673_v26, %v764_v54 }
 0x195   : > { %v709_v57 = vpop.permute.xlu1 %708  ;;  %v749_v58 = vpop.permute.xlu0 %748 }
 0x196   : > { %796 = vst [vmem:[%s1677_s23 + $0x30] sm:$0xff] %v780_v55  ;;  %803 = vst [vmem:[%s1677_s23 + $0x68] sm:$0xff] %v787_v56  ;;  %v758_v59 = vmul.f32 %v1036_v22, %v709_v57  ;;  %v766_v60 = vmul.f32 %v1048_v23, %v749_v58 }
 0x198   : > { %v781_v61 = vadd.f32 %v1673_v26, %v758_v59  ;;  %v789_v62 = vadd.f32 %v1673_v26, %v766_v60 }
 0x199   : > { %v714_v63 = vpop.permute.xlu1 %713 }
 0x19a   : > { %797 = vst [vmem:[%s1677_s23 + $0x38] sm:$0xff] %v781_v61  ;;  %805 = vst [vmem:[%s1677_s23 + $0x78] sm:$0xff] %v789_v62  ;;  %v759_v0 = vmul.f32 %v714_v63, %v1662_v13 }
 0x19c   : > { %v782_v1 = vadd.f32 %v1673_v26, %v759_v0 }
 0x19d   : > { %v724_v2 = vpop.permute.xlu1 %723 }
 0x19e   : > { %798 = vst [vmem:[%s1677_s23 + $0x40] sm:$0xff] %v782_v1  ;;  %v761_v3 = vmul.f32 %v724_v2, %v1664_v17 }
 0x1a0   : > { %v784_v4 = vadd.f32 %v1673_v26, %v761_v3 }
 0x1a1   : > { %v734_v5 = vpop.permute.xlu1 %733 }
 0x1a2   : > { %800 = vst [vmem:[%s1677_s23 + $0x50] sm:$0xff] %v784_v4  ;;  %v763_v6 = vmul.f32 %v734_v5, %v1666_v21 }
 0x1a4   : > { %v786_v7 = vadd.f32 %v1673_v26, %v763_v6 }
 0x1a5   : > { %v744_v8 = vpop.permute.xlu1 %743 }
 0x1a6   : > { %802 = vst [vmem:[%s1677_s23 + $0x60] sm:$0xff] %v786_v7  ;;  %v765_v9 = vmul.f32 %v744_v8, %v1668_v25 }
 0x1a8   : > { %v788_v10 = vadd.f32 %v1673_v26, %v765_v9 }
 0x1aa   : > { %804 = vst [vmem:[%s1677_s23 + $0x70] sm:$0xff] %v788_v10 }
 0x1ab   : > { %1277 = shalt.err (!%p1274_p11)
}
 0x1ac   : > { %s1278_s9 = scalar_lea.hbm %s1717_s29, 2048  ;;  %s1282_s11 = scalar_lea.hbm %s1773_s3, 4096 }
 0x1ad   : > { %p1279_p1 = scmp.ne.s32.totalorder %s1717_s29, %s1278_s9  ;;  %p1283_p5 = scmp.lt.u32.totalorder %s1717_s29, %s1773_s3 }
 0x1ae   : > { %p1284_p4 = scmp.lt.u32.totalorder %s1282_s11, %s1278_s9  ;;  %p1286_p0 = scmp.lt.u32.totalorder %s1278_s9, %s1717_s29 }
 0x1af   : > { %p1280_p6 = pnand %p1279_p1, %p1784_p3 }
 0x1b0   : > { %p1285_p8 = por %p1284_p4, %p1283_p5 }
 0x1b1   : > { %p1281_p2 = pneg %p1280_p6 }
 0x1b2   : > { %p1287_p12 = por %p1286_p0, %p1285_p8 }
 0x1b4   : > { %p1288_p13 = pnand %p1287_p12, %p1281_p2 }
 0x1b6   : > { %1291 = shalt.err (!%p1288_p13)
}
 0x1b7   : > { %s1359_s23 = smov 128   ;;  %s1360_s4 = smov 8  }
 0x1b8   : > { %1101 = dma.vmem_to_hbm [thread:$0]  (%p1784_p3), %s1719_s7, 2048, %s1717_s29, %s807_s5, %s1359_s23, %s1359_s23, %s1360_s4  }
 0x1b9 PF: > { %s837_s6 = sand.u32 1, %s1330_s12   ;;  %p1785_p7 = scmp.ne.s32.totalorder %s1779_s27, 0 }
 0x1ba   : > { %p1786_p10 = scmp.ge.s32.totalorder %s1350_s17, 2  ;;  %s838_s22 = scalar_lea.sflag [#allocation5], %s837_s6 }
 0x1bc   : > { %p1111_p9 = pnand %p1786_p10, %p1785_p7 }
 0x1be   : > { %1325 = dma.done.wait (!%p1111_p9), %s838_s22, 2048  }
 0x1bf   : > { %1327 = vsyncadd (!%p1111_p9), %s838_s22, 4294965248  ;;  %s22_s17 = sadd.s32 1, %s1350_s17   ;;  %s1787_s12 = smov %s1334_s13 }
 0x1c0   : > { %p19_p11 = scmp.ge.s32.totalorder %s22_s17, 4   ;;  %s1788_s13 = smov %s1338_s14 }
 0x1c1   : > { %s1789_s14 = smov %s1437_s26  ;;  %s1790_s15 = smov %s1346_s16 }
 0x1c2   : > { %s1791_s16 = smov %s1793_s20  ;;  %21 = sbr.rel (!%p19_p11) target bundleno = 8 (0x8), region = 99 }
 0x1c9   :  { %843 = vsyncpa [#allocation4], 1 }
 0x1ca   :  { %845 = vsyncpa [#allocation4 + $0x1], 1 }
 0x1cb   :  { %846 = vsyncpa [#allocation7], 1 }
 0x1cc   :  { %848 = vsyncpa [#allocation7 + $0x1], 1 }
 0x1cd   :  { %849 = vsyncpa [#allocation5], 1 }
 0x1ce   :  { %851 = vsyncpa [#allocation5 + $0x1], 1 }

</bundles_post_ra>
